<compile_context>
chip_gen: v7x
topology: tpu7x:2x2x1
jax: 0.10.0
libtpu: 0.0.40
codegen_flags: <defaults>
</compile_context>

<pallas_src>
import functools

import jax
import jax.numpy as jnp
from jax import lax
from jax.experimental import pallas as pl
from jax.experimental.pallas import tpu as pltpu

_TK_MAX = 2048                       # K-tile cap (multiple of 256); sized for v7x's 64 MiB VMEM
_VMEM_LIMIT = 48 * 1024 * 1024       # headroom under v7x physical, well under v5e/v6e 128 MiB


def _round_up(x, mult):
    return ((x + mult - 1) // mult) * mult


def _plan_k_tiling(m):
    """Pad m to a multiple of 256 and pick a K-tile (multiple of 256, <= _TK_MAX)."""
    units = -(-m // 256)                      # ceil(m / 256)
    num_k = -(-units // (_TK_MAX // 256))     # number of K steps
    units_per_tile = -(-units // num_k)
    tk = units_per_tile * 256
    m_pad = tk * num_k
    return m_pad, tk, num_k


def _flatten_pad(x, n_pad, m_pad):
    """(B, C, H, W) -> zero-padded (n_pad, m_pad) feature matrix (source dtype kept)."""
    b, c, h, w = x.shape
    n, m = b * c, h * w
    feats = x.reshape(n, m)
    if n_pad != n or m_pad != m:
        feats = jnp.pad(feats, ((0, n_pad - n), (0, m_pad - m)))
    return feats


def _compiler_params():
    return pltpu.CompilerParams(
        dimension_semantics=("arbitrary",),   # K axis is a reduction
        vmem_limit_bytes=_VMEM_LIMIT,
    )


def _cost(n_pad, m_pad, in_itemsize, extra_bytes):
    return pl.CostEstimate(
        flops=2 * n_pad * n_pad * m_pad,
        transcendentals=0,
        bytes_accessed=n_pad * m_pad * in_itemsize + n_pad * n_pad * 4 + extra_bytes,
    )


# ---------------------------------------------------------------------------
# Kernels
# ---------------------------------------------------------------------------

def _gram_kernel(feat_ref, g_ref, acc_ref, *, inv_denom):
    """Accumulate one K-tile of F @ F.T; scale by 1/(B*C*H*W) on the last step."""
    k = pl.program_id(0)

    @pl.when(k == 0)
    def _():
        acc_ref[...] = jnp.zeros_like(acc_ref)

    f = feat_ref[...]
    acc_ref[...] += lax.dot_general(
        f, f,
        dimension_numbers=(((1,), (1,)), ((), ())),   # contract dim 1 vs dim 1 (no f.T)
        preferred_element_type=jnp.float32,
    )

    @pl.when(k == pl.num_programs(0) - 1)
    def _():
        g_ref[...] = acc_ref[...] * inv_denom


def _style_loss_kernel(feat_ref, tgt_ref, loss_ref, acc_ref, *, inv_denom, inv_nelem):
    """Fused: K-tiled gram of the input + MSE against the precomputed target gram."""
    k = pl.program_id(0)

    @pl.when(k == 0)
    def _():
        acc_ref[...] = jnp.zeros_like(acc_ref)

    f = feat_ref[...]
    acc_ref[...] += lax.dot_general(
        f, f,
        dimension_numbers=(((1,), (1,)), ((), ())),
        preferred_element_type=jnp.float32,
    )

    @pl.when(k == pl.num_programs(0) - 1)
    def _():
        diff = acc_ref[...] * inv_denom - tgt_ref[...].astype(jnp.float32)
        loss_ref[0, 0] = jnp.sum(diff * diff) * inv_nelem


# ---------------------------------------------------------------------------
# Wrappers
# ---------------------------------------------------------------------------

def _gram_matrix_padded(x):
    """Returns the (n_pad, n_pad) gram matrix (rows/cols beyond n are zero) and n."""
    b, c, h, w = x.shape
    n, m = b * c, h * w
    n_pad = _round_up(n, 128)
    m_pad, tk, num_k = _plan_k_tiling(m)
    feats = _flatten_pad(x, n_pad, m_pad)
    inv_denom = 1.0 / float(n * m)            # PyTorch divisor: original B*C*H*W

    g_pad = pl.pallas_call(
        functools.partial(_gram_kernel, inv_denom=inv_denom),
        out_shape=jax.ShapeDtypeStruct((n_pad, n_pad), jnp.float32),
        grid_spec=pltpu.PrefetchScalarGridSpec(
            num_scalar_prefetch=0,
            grid=(num_k,),
            in_specs=[pl.BlockSpec((n_pad, tk), lambda k: (0, k))],
            out_specs=pl.BlockSpec((n_pad, n_pad), lambda k: (0, 0)),
            scratch_shapes=[pltpu.VMEM((n_pad, n_pad), jnp.float32)],
        ),
        compiler_params=_compiler_params(),
        cost_estimate=_cost(n_pad, m_pad, feats.dtype.itemsize, n_pad * n_pad * 4),
    )(feats)
    return g_pad, n


def gram_matrix(x):
    """Pallas equivalent of the PyTorch gram_matrix (x is NCHW), shape (B*C, B*C)."""
    g_pad, n = _gram_matrix_padded(x)
    return g_pad[:n, :n]


def _style_loss_padded(x, target_gram_padded):
    """MSE(gram(x), target_gram) with both grams zero-padded to (n_pad, n_pad)."""
    b, c, h, w = x.shape
    n, m = b * c, h * w
    n_pad = _round_up(n, 128)
    assert target_gram_padded.shape == (n_pad, n_pad)
    m_pad, tk, num_k = _plan_k_tiling(m)
    feats = _flatten_pad(x, n_pad, m_pad)
    inv_denom = 1.0 / float(n * m)            # gram normalization (original sizes)
    inv_nelem = 1.0 / float(n * n)            # MSE mean over the original (n, n) gram

    loss = pl.pallas_call(
        functools.partial(
            _style_loss_kernel, inv_denom=inv_denom, inv_nelem=inv_nelem
        ),
        out_shape=jax.ShapeDtypeStruct((1, 1), jnp.float32),
        grid_spec=pltpu.PrefetchScalarGridSpec(
            num_scalar_prefetch=0,
            grid=(num_k,),
            in_specs=[
                pl.BlockSpec((n_pad, tk), lambda k: (0, k)),
                pl.BlockSpec((n_pad, n_pad), lambda k: (0, 0)),
            ],
            out_specs=pl.BlockSpec(memory_space=pltpu.SMEM),
            scratch_shapes=[pltpu.VMEM((n_pad, n_pad), jnp.float32)],
        ),
        compiler_params=_compiler_params(),
        cost_estimate=_cost(n_pad, m_pad, feats.dtype.itemsize, n_pad * n_pad * 4),
    )(feats, target_gram_padded)
    return loss[0, 0]


class StyleLoss:
    """JAX/Pallas port of the PyTorch StyleLoss module.

    __init__ stores the (detached) gram matrix of the target feature map;
    forward computes the MSE style loss, stashes it on `self.loss`, and
    returns the input unchanged (pass-through, like the PyTorch module).
    """

    def __init__(self, target_feature):
        target_padded, n = _gram_matrix_padded(target_feature)
        self._target_padded = target_padded          # fed to the fused loss kernel
        self.target = target_padded[:n, :n]           # PyTorch-equivalent (n, n) gram
        self.loss = None

    def forward(self, x):
        self.loss = _style_loss_padded(x, self._target_padded)
        return x

    __call__ = forward


if __name__ == "__main__":
    key = jax.random.PRNGKey(0)
    k_tgt, k_in = jax.random.split(key)

    # Small NCHW feature maps: batch=2, channels=4, spatial=16x16.
    target_feature = jax.random.normal(k_tgt, (2, 4, 16, 16), dtype=jnp.float32)
    x = jax.random.normal(k_in, (2, 4, 16, 16), dtype=jnp.float32)

    module = StyleLoss(target_feature)
    out = module(x)

    jax.block_until_ready(out)
    jax.block_until_ready(module.loss)

    # Sanity check against a pure-JAX reference.
    def _ref_gram(t):
        b, c, h, w = t.shape
        f = t.reshape(b * c, h * w)
        return (f @ f.T) / (b * c * h * w)

    ref_loss = jnp.mean((_ref_gram(x) - _ref_gram(target_feature)) ** 2)
    assert jnp.allclose(module.loss, ref_loss, rtol=1e-5, atol=1e-6), (
        module.loss,
        ref_loss,
    )
    assert jnp.allclose(module.target, _ref_gram(target_feature), rtol=1e-5, atol=1e-6)
    assert jnp.array_equal(out, x)  # forward is a pass-through

    print("KERNEL_OK")
</pallas_src>

<mosaic_0001>
module attributes {stable_mosaic.version = 11 : i64} {
  func.func @_gram_kernel(%arg0: i32, %arg1: memref<128x256xf32, #tpu.memory_space<vmem>>, %arg2: memref<128x128xf32, #tpu.memory_space<vmem>>, %arg3: memref<128x128xf32, #tpu.memory_space<vmem>>) attributes {dimension_semantics = [#tpu.dimension_semantics<arbitrary>], iteration_bounds = array<i64: 1>, scalar_prefetch = 0 : i64, scratch_operands = 1 : i64, tpu.core_type = #tpu.core_type<tc>, window_params = [{transform_indices = @transform_0, window_bounds = array<i64: 128, 256>}, {pipeline_mode = #tpu.pipeline_mode<synchronous>, transform_indices = @transform_1, window_bounds = array<i64: 128, 128>}]} {
    %c0_i32 = arith.constant 0 : i32
    %0 = arith.cmpi eq, %arg0, %c0_i32 : i32
    %1 = arith.extui %0 : i1 to i32
    %c0_i32_0 = arith.constant 0 : i32
    %2 = arith.cmpi ne, %1, %c0_i32_0 : i32
    scf.if %2 {
      %cst_8 = arith.constant 0.000000e+00 : f32
      %11 = vector.broadcast %cst_8 : f32 to vector<128x128xf32>
      %c0_9 = arith.constant 0 : index
      %c0_10 = arith.constant 0 : index
      %12 = vector.load %arg3[%c0_9, %c0_10] : memref<128x128xf32, #tpu.memory_space<vmem>>, vector<128x128xf32>
      tpu.vector_store %arg3[%c0_9, %c0_10], %11 {strides = array<i32>} : memref<128x128xf32, #tpu.memory_space<vmem>>, vector<128x128xf32>,
    } else {
    }
    %c0 = arith.constant 0 : index
    %c0_1 = arith.constant 0 : index
    %3 = vector.load %arg1[%c0, %c0_1] : memref<128x256xf32, #tpu.memory_space<vmem>>, vector<128x256xf32>
    %c0_2 = arith.constant 0 : index
    %c0_3 = arith.constant 0 : index
    %4 = vector.load %arg3[%c0_2, %c0_3] : memref<128x128xf32, #tpu.memory_space<vmem>>, vector<128x128xf32>
    %cst = arith.constant dense<0.000000e+00> : vector<128x128xf32>
    %5 = tpu.matmul %3, %3, %cst {dimension_numbers = #tpu.dot_dimension_numbers<[1], [1], [0], [0], [0, 0, 1, 0], [], []>} : vector<128x256xf32>, vector<128x256xf32>, vector<128x128xf32> -> vector<128x128xf32>
    %6 = arith.addf %4, %5 : vector<128x128xf32>
    %c0_4 = arith.constant 0 : index
    %c0_5 = arith.constant 0 : index
    %7 = vector.load %arg3[%c0_4, %c0_5] : memref<128x128xf32, #tpu.memory_space<vmem>>, vector<128x128xf32>
    tpu.vector_store %arg3[%c0_4, %c0_5], %6 {strides = array<i32>} : memref<128x128xf32, #tpu.memory_space<vmem>>, vector<128x128xf32>,
    %c0_i32_6 = arith.constant 0 : i32
    %8 = arith.cmpi eq, %arg0, %c0_i32_6 : i32
    %9 = arith.extui %8 : i1 to i32
    %c0_i32_7 = arith.constant 0 : i32
    %10 = arith.cmpi ne, %9, %c0_i32_7 : i32
    scf.if %10 {
      %c0_8 = arith.constant 0 : index
      %c0_9 = arith.constant 0 : index
      %11 = vector.load %arg3[%c0_8, %c0_9] : memref<128x128xf32, #tpu.memory_space<vmem>>, vector<128x128xf32>
      %cst_10 = arith.constant 4.8828125E-4 : f32
      %12 = vector.broadcast %cst_10 : f32 to vector<128x128xf32>
      %13 = arith.mulf %11, %12 : vector<128x128xf32>
      %c0_11 = arith.constant 0 : index
      %c0_12 = arith.constant 0 : index
      %14 = vector.load %arg2[%c0_11, %c0_12] : memref<128x128xf32, #tpu.memory_space<vmem>>, vector<128x128xf32>
      tpu.vector_store %arg2[%c0_11, %c0_12], %13 {strides = array<i32>} : memref<128x128xf32, #tpu.memory_space<vmem>>, vector<128x128xf32>,
    } else {
    }
    return
  }
  func.func @transform_0(%arg0: i32) -> (i32, i32) {
    %c0_i32 = arith.constant 0 : i32
    %c0_i32_0 = arith.constant 0 : i32
    return %c0_i32, %arg0 : i32, i32
  }
  func.func @transform_1(%arg0: i32) -> (i32, i32) {
    %c0_i32 = arith.constant 0 : i32
    %c0_i32_0 = arith.constant 0 : i32
    %c0_i32_1 = arith.constant 0 : i32
    return %c0_i32, %c0_i32_0 : i32, i32
  }
}

</mosaic_0001>

<bundles_post_ra>
// kernel: tpu_custom_call.1
= control target key start
LH: loop header
LB: loop body
LE: loop exit
PB: predicated region body
PF: predicated region fallthrough
CT: control target
= control target key end

     0   :  { %6 = vsyncpa [#allocation4], 0  ;;  %s538_s0 = inlined_call_operand.hbm [shape: f32[128,256], index: 0, kind: input, shape index: {}]   ;;  %s539_s1 = inlined_call_operand.hbm [shape: f32[128,128], index: 1, kind: output, shape index: {}]  }
   0x1   :  { %7 = vsyncpa [#allocation5], 0  ;;  %s438_s6 = smov [#allocation3]   ;;  %s390_s10 = scalar_lea.hbm %s538_s0, 4096 }
   0x2   :  { %s13_s7 = sshll.u32 %s438_s6, 4  ;;  %p391_p0 = scmp.ne.s32.totalorder %s538_s0, %s390_s10  ;;  %s14_s7 = int_to_ptr.vmem [resolvable:$true] %s13_s7 }
   0x3   :  { %p394_p1 = scmp.lt.u32.totalorder %s390_s10, %s538_s0 }
   0x5   :  { %p396_p2 = pnand %p394_p1, %p391_p0 }
   0x7   :  { %399 = shalt.err (!%p396_p2)
}
   0x8   :  { %s400_s15 = scalar_lea.vmem %s14_s7, 4096  ;;  %p405_p4 = scmp.lt.s32.totalorder %s14_s7, %s14_s7 }
   0x9   :  { %p401_p3 = scmp.ne.s32.totalorder %s14_s7, %s400_s15  ;;  %p406_p5 = scmp.lt.s32.totalorder %s400_s15, %s400_s15 }
   0xb   :  { %p407_p6 = por %p406_p5, %p405_p4 }
   0xd   :  { %p408_p7 = pnand %p407_p6, %p401_p3 }
   0xf   :  { %411 = shalt.err (!%p408_p7)
}
  0x10   :  { %s439_s16 = smov 256   ;;  %s440_s17 = smov 16  }
  0x11   :  { %19 = dma.hbm_to_vmem [thread:$0]  %s538_s0, 4096, %s14_s7, [#allocation4], %s439_s16, %s439_s16, %s440_s17  }
  0x12   :  { %434 = dma.done.wait [#allocation4], 4096  }
  0x13   :  { %435 = vsyncadd [#allocation4], 4294963200  ;;  %v44_v0 = vld [vmem:[#allocation3 + $0x8] sm:$0xff]  ;;  %v466_v1 = vld [vmem:[#allocation3 + $0x18] sm:$0xff]  ;;  %s441_s0 = smov [#allocation6]  }
  0x14   :  { %v468_v2 = vld [vmem:[#allocation3] sm:$0xff]  ;;  %v336_v3 = vpack.c.bf16 %v466_v1, %v44_v0  ;;  %v471_v4 = vld [vmem:[#allocation3 + $0x10] sm:$0xff]  ;;  %v473_v5 = vld [vmem:[#allocation3 + $0x28] sm:$0xff]  ;;  %155 = vmatprep.mubr.f32.mxu0 %v44_v0  ;;  %s324_s20 = sshll.u32 %s441_s0, 4  ;;  %s325_s20 = int_to_ptr.vmem [resolvable:$true] %s324_s20 }
  0x15   :  { %v475_v6 = vld [vmem:[#allocation3 + $0x38] sm:$0xff]  ;;  %v338_v7 = vpack.c.bf16 %v471_v4, %v468_v2  ;;  %v481_v9 = vld [vmem:[#allocation3 + $0x20] sm:$0xff]  ;;  %v483_v10 = vld [vmem:[#allocation3 + $0x30] sm:$0xff]  ;;  %s412_s21 = scalar_lea.vmem %s325_s20, 2048  ;;  %p417_p9 = scmp.lt.s32.totalorder %s325_s20, %s325_s20 }
  0x16   :  { %v340_v8 = vpack.c.bf16 %v475_v6, %v473_v5  ;;  %337 = vmatprep.subr.bf16.mxu0 %v336_v3  ;;  %368 = vmatprep.subr.bf16.mxu1 %v336_v3  ;;  %v60_v11 = vld [vmem:[#allocation3 + $0x88] sm:$0xff]  ;;  %v487_v13 = vld [vmem:[#allocation3 + $0x58] sm:$0xff]  ;;  %v342_v14 = vpack.c.bf16 %v483_v10, %v481_v9  ;;  %v493_v16 = vld [vmem:[#allocation3 + $0x40] sm:$0xff]  ;;  %p413_p8 = scmp.ne.s32.totalorder %s325_s20, %s412_s21  ;;  %p418_p10 = scmp.lt.s32.totalorder %s412_s21, %s412_s21 }
  0x17   :  { %339 = vmatpush1.bf16.xpose.msra.mxu0 %v338_v7  ;;  %376 = vmatpush1.bf16.xpose.msra.mxu1 %v338_v7  ;;  %v485_v12 = vld [vmem:[#allocation3 + $0x48] sm:$0xff]  ;;  %v495_v17 = vld [vmem:[#allocation3 + $0x50] sm:$0xff]  ;;  %v499_v19 = vld [vmem:[#allocation3 + $0x78] sm:$0xff] }
  0x18   :  { %341 = vmatprep.subr.bf16.mxu0 %v340_v8  ;;  %369 = vmatprep.subr.bf16.mxu1 %v340_v8  ;;  %v344_v15 = vpack.c.bf16 %v487_v13, %v485_v12  ;;  %v497_v18 = vld [vmem:[#allocation3 + $0x68] sm:$0xff]  ;;  %v346_v20 = vpack.c.bf16 %v495_v17, %v493_v16  ;;  %v505_v22 = vld [vmem:[#allocation3 + $0x60] sm:$0xff]  ;;  %v507_v23 = vld [vmem:[#allocation3 + $0x70] sm:$0xff]  ;;  %p419_p11 = por %p418_p10, %p417_p9 }
  0x19   :  { %195 = vmatprep.mubr.f32.mxu1 %v60_v11  ;;  %v348_v21 = vpack.c.bf16 %v499_v19, %v497_v18  ;;  %v62_v24 = vld [vmem:[#allocation3 + $0x98] sm:$0xff]  ;;  %v350_v25 = vpack.c.bf16 %v507_v23, %v505_v22  ;;  %v59_v27 = vld [vmem:[#allocation3 + $0x80] sm:$0xff]  ;;  %v61_v28 = vld [vmem:[#allocation3 + $0x90] sm:$0xff] }
  0x1a   :  { %v352_v26 = vpack.c.bf16 %v62_v24, %v60_v11  ;;  %v64_v29 = vld [vmem:[#allocation3 + $0xa8] sm:$0xff]  ;;  %v66_v30 = vld [vmem:[#allocation3 + $0xb8] sm:$0xff]  ;;  %v354_v31 = vpack.c.bf16 %v61_v28, %v59_v27  ;;  %v63_v33 = vld [vmem:[#allocation3 + $0xa0] sm:$0xff]  ;;  %p420_p12 = pnand %p419_p11, %p413_p8 }
  0x1b   :  { %v356_v32 = vpack.c.bf16 %v66_v30, %v64_v29  ;;  %v65_v34 = vld [vmem:[#allocation3 + $0xb0] sm:$0xff]  ;;  %v68_v35 = vld [vmem:[#allocation3 + $0xc8] sm:$0xff]  ;;  %v70_v36 = vld [vmem:[#allocation3 + $0xd8] sm:$0xff] }
  0x1c   :  { %v358_v37 = vpack.c.bf16 %v65_v34, %v63_v33  ;;  %v360_v38 = vpack.c.bf16 %v70_v36, %v68_v35  ;;  %v67_v39 = vld [vmem:[#allocation3 + $0xc0] sm:$0xff]  ;;  %v69_v40 = vld [vmem:[#allocation3 + $0xd0] sm:$0xff]  ;;  %v72_v41 = vld [vmem:[#allocation3 + $0xe8] sm:$0xff] }
  0x1d   :  { %v74_v42 = vld [vmem:[#allocation3 + $0xf8] sm:$0xff]  ;;  %v362_v43 = vpack.c.bf16 %v69_v40, %v67_v39  ;;  %v71_v45 = vld [vmem:[#allocation3 + $0xe0] sm:$0xff]  ;;  %v73_v46 = vld [vmem:[#allocation3 + $0xf0] sm:$0xff] }
  0x1e   :  { %v364_v44 = vpack.c.bf16 %v74_v42, %v72_v41  ;;  %v366_v47 = vpack.c.bf16 %v73_v46, %v71_v45 }
  0x1f   :  { %343 = vmatpush1.bf16.xpose.msra.mxu0 %v342_v14  ;;  %377 = vmatpush1.bf16.xpose.msra.mxu1 %v342_v14 }
  0x20   :  { %345 = vmatprep.subr.bf16.mxu0 %v344_v15  ;;  %370 = vmatprep.subr.bf16.mxu1 %v344_v15 }
  0x27   :  { %347 = vmatpush1.bf16.xpose.msra.mxu0 %v346_v20  ;;  %378 = vmatpush1.bf16.xpose.msra.mxu1 %v346_v20 }
  0x28   :  { %349 = vmatprep.subr.bf16.mxu0 %v348_v21  ;;  %371 = vmatprep.subr.bf16.mxu1 %v348_v21 }
  0x2f   :  { %351 = vmatpush1.bf16.xpose.msra.mxu0 %v350_v25  ;;  %379 = vmatpush1.bf16.xpose.msra.mxu1 %v350_v25 }
  0x30   :  { %353 = vmatprep.subr.bf16.mxu0 %v352_v26  ;;  %372 = vmatprep.subr.bf16.mxu1 %v352_v26 }
  0x37   :  { %355 = vmatpush1.bf16.xpose.msra.mxu0 %v354_v31  ;;  %380 = vmatpush1.bf16.xpose.msra.mxu1 %v354_v31 }
  0x38   :  { %357 = vmatprep.subr.bf16.mxu0 %v356_v32  ;;  %373 = vmatprep.subr.bf16.mxu1 %v356_v32 }
  0x3f   :  { %359 = vmatpush1.bf16.xpose.msra.mxu0 %v358_v37  ;;  %381 = vmatpush1.bf16.xpose.msra.mxu1 %v358_v37 }
  0x40   :  { %361 = vmatprep.subr.bf16.mxu0 %v360_v38  ;;  %374 = vmatprep.subr.bf16.mxu1 %v360_v38 }
  0x47   :  { %363 = vmatpush1.bf16.xpose.msra.mxu0 %v362_v43  ;;  %382 = vmatpush1.bf16.xpose.msra.mxu1 %v362_v43 }
  0x48   :  { %365 = vmatprep.subr.bf16.mxu0 %v364_v44  ;;  %375 = vmatprep.subr.bf16.mxu1 %v364_v44 }
  0x4f   :  { %367 = vmatpush1.bf16.xpose.msra.mxu0 %v366_v47  ;;  %383 = vmatpush1.bf16.xpose.msra.mxu1 %v366_v47 }
  0x56   :  { %156 = vmatmul.mubr.f32.vlgmr.msra.gmra.mrb[0].mxu0 %v468_v2  ;;  %196 = vmatmul.mubr.f32.vlgmr.msra.gmra.mrb[0].mxu1 %v59_v27 }
  0x57   :  { %160 = vmatprep.mubr.f32.mxu0 %v466_v1  ;;  %200 = vmatprep.mubr.f32.mxu1 %v62_v24 }
  0x5a   :  { %161 = vmatmul.mubr.f32.gmra.mrb[2].mxu0 %v471_v4  ;;  %201 = vmatmul.mubr.f32.gmra.mrb[2].mxu1 %v61_v28 }
  0x5b   :  { %165 = vmatprep.mubr.f32.mxu0 %v473_v5  ;;  %205 = vmatprep.mubr.f32.mxu1 %v64_v29 }
  0x5e   :  { %166 = vmatmul.mubr.f32.gmra.mrb[4].mxu0 %v481_v9  ;;  %206 = vmatmul.mubr.f32.gmra.mrb[4].mxu1 %v63_v33 }
  0x5f   :  { %170 = vmatprep.mubr.f32.mxu0 %v475_v6  ;;  %210 = vmatprep.mubr.f32.mxu1 %v66_v30 }
  0x62   :  { %171 = vmatmul.mubr.f32.gmra.mrb[6].mxu0 %v483_v10  ;;  %211 = vmatmul.mubr.f32.gmra.mrb[6].mxu1 %v65_v34 }
  0x63   :  { %175 = vmatprep.mubr.f32.mxu0 %v485_v12  ;;  %215 = vmatprep.mubr.f32.mxu1 %v68_v35 }
  0x66   :  { %176 = vmatmul.mubr.f32.gmra.mrb[8].mxu0 %v493_v16  ;;  %216 = vmatmul.mubr.f32.gmra.mrb[8].mxu1 %v67_v39 }
  0x67   :  { %180 = vmatprep.mubr.f32.mxu0 %v487_v13  ;;  %220 = vmatprep.mubr.f32.mxu1 %v70_v36 }
  0x6a   :  { %181 = vmatmul.mubr.f32.gmra.mrb[10].mxu0 %v495_v17  ;;  %221 = vmatmul.mubr.f32.gmra.mrb[10].mxu1 %v69_v40 }
  0x6b   :  { %185 = vmatprep.mubr.f32.mxu0 %v497_v18  ;;  %225 = vmatprep.mubr.f32.mxu1 %v72_v41 }
  0x6e   :  { %186 = vmatmul.mubr.f32.gmra.mrb[12].mxu0 %v505_v22  ;;  %226 = vmatmul.mubr.f32.gmra.mrb[12].mxu1 %v71_v45 }
  0x6f   :  { %190 = vmatprep.mubr.f32.mxu0 %v499_v19  ;;  %230 = vmatprep.mubr.f32.mxu1 %v74_v42 }
  0x72   :  { %191 = vmatmul.mubr.f32.gmra.mrb[14].mxu0 %v507_v23  ;;  %231 = vmatmul.mubr.f32.gmra.mrb[14].mxu1 %v73_v46 }
 0x129   :  { %v157_v48 = vpop.f32.mrb[0].mxu0  ;;  %v197_v49 = vpop.f32.mrb[0].mxu1 }
 0x12a   :  { %v287_v50 = vmul.f32 0.00048828125, %v157_v48  ;;  %v295_v51 = vmul.f32 0.00048828125, %v197_v49  ;;  %v159_v52 = vpop.f32.mrb[1].mxu0  ;;  %v199_v53 = vpop.f32.mrb[1].mxu1 }
 0x12c   :  { %303 = vst [vmem:[#allocation6] sm:$0xff] %v287_v50  ;;  %311 = vst [vmem:[#allocation6 + $0x40] sm:$0xff] %v295_v51 }
 0x12d   :  { %v162_v54 = vpop.f32.mrb[2].mxu0  ;;  %v202_v55 = vpop.f32.mrb[2].mxu1 }
 0x12e   :  { %v288_v56 = vmul.f32 0.00048828125, %v162_v54  ;;  %v296_v57 = vmul.f32 0.00048828125, %v202_v55  ;;  %v164_v58 = vpop.f32.mrb[3].mxu0  ;;  %v204_v59 = vpop.f32.mrb[3].mxu1 }
 0x130   :  { %304 = vst [vmem:[#allocation6 + $0x8] sm:$0xff] %v288_v56  ;;  %312 = vst [vmem:[#allocation6 + $0x48] sm:$0xff] %v296_v57 }
 0x131   :  { %v167_v60 = vpop.f32.mrb[4].mxu0  ;;  %v207_v61 = vpop.f32.mrb[4].mxu1 }
 0x132   :  { %v289_v62 = vmul.f32 0.00048828125, %v167_v60  ;;  %v297_v63 = vmul.f32 0.00048828125, %v207_v61  ;;  %v169_v0 = vpop.f32.mrb[5].mxu0  ;;  %v209_v1 = vpop.f32.mrb[5].mxu1 }
 0x134   :  { %305 = vst [vmem:[#allocation6 + $0x10] sm:$0xff] %v289_v62  ;;  %313 = vst [vmem:[#allocation6 + $0x50] sm:$0xff] %v297_v63 }
 0x135   :  { %v172_v2 = vpop.f32.mrb[6].mxu0  ;;  %v212_v3 = vpop.f32.mrb[6].mxu1 }
 0x136   :  { %v290_v4 = vmul.f32 0.00048828125, %v172_v2  ;;  %v298_v5 = vmul.f32 0.00048828125, %v212_v3  ;;  %v174_v6 = vpop.f32.mrb[7].mxu0  ;;  %v214_v7 = vpop.f32.mrb[7].mxu1 }
 0x138   :  { %306 = vst [vmem:[#allocation6 + $0x18] sm:$0xff] %v290_v4  ;;  %314 = vst [vmem:[#allocation6 + $0x58] sm:$0xff] %v298_v5 }
 0x139   :  { %v177_v8 = vpop.f32.mrb[8].mxu0  ;;  %v217_v9 = vpop.f32.mrb[8].mxu1 }
 0x13a   :  { %v291_v10 = vmul.f32 0.00048828125, %v177_v8  ;;  %v299_v11 = vmul.f32 0.00048828125, %v217_v9  ;;  %v179_v12 = vpop.f32.mrb[9].mxu0  ;;  %v219_v13 = vpop.f32.mrb[9].mxu1 }
 0x13c   :  { %307 = vst [vmem:[#allocation6 + $0x20] sm:$0xff] %v291_v10  ;;  %315 = vst [vmem:[#allocation6 + $0x60] sm:$0xff] %v299_v11 }
 0x13d   :  { %v182_v14 = vpop.f32.mrb[10].mxu0  ;;  %v222_v15 = vpop.f32.mrb[10].mxu1 }
 0x13e   :  { %v292_v16 = vmul.f32 0.00048828125, %v182_v14  ;;  %v300_v17 = vmul.f32 0.00048828125, %v222_v15  ;;  %v184_v18 = vpop.f32.mrb[11].mxu0  ;;  %v224_v19 = vpop.f32.mrb[11].mxu1 }
 0x140   :  { %308 = vst [vmem:[#allocation6 + $0x28] sm:$0xff] %v292_v16  ;;  %316 = vst [vmem:[#allocation6 + $0x68] sm:$0xff] %v300_v17 }
 0x141   :  { %v187_v20 = vpop.f32.mrb[12].mxu0  ;;  %v227_v21 = vpop.f32.mrb[12].mxu1 }
 0x142   :  { %v293_v22 = vmul.f32 0.00048828125, %v187_v20  ;;  %v301_v23 = vmul.f32 0.00048828125, %v227_v21  ;;  %v189_v24 = vpop.f32.mrb[13].mxu0  ;;  %v229_v25 = vpop.f32.mrb[13].mxu1 }
 0x144   :  { %309 = vst [vmem:[#allocation6 + $0x30] sm:$0xff] %v293_v22  ;;  %317 = vst [vmem:[#allocation6 + $0x70] sm:$0xff] %v301_v23 }
 0x145   :  { %v192_v26 = vpop.f32.mrb[14].mxu0  ;;  %v232_v27 = vpop.f32.mrb[14].mxu1 }
 0x146   :  { %v294_v28 = vmul.f32 0.00048828125, %v192_v26  ;;  %v302_v29 = vmul.f32 0.00048828125, %v232_v27  ;;  %v194_v30 = vpop.f32.mrb[15].mxu0  ;;  %v234_v31 = vpop.f32.mrb[15].mxu1 }
 0x148   :  { %310 = vst [vmem:[#allocation6 + $0x38] sm:$0xff] %v294_v28  ;;  %318 = vst [vmem:[#allocation6 + $0x78] sm:$0xff] %v302_v29 }
 0x149   :  { %423 = shalt.err (!%p420_p12)
}
 0x14a   :  { %s424_s24 = scalar_lea.hbm %s539_s1, 2048 }
 0x14b   :  { %p425_p13 = scmp.ne.s32.totalorder %s539_s1, %s424_s24  ;;  %p428_p0 = scmp.lt.u32.totalorder %s424_s24, %s539_s1 }
 0x14d   :  { %p430_p1 = pnand %p428_p0, %p425_p13 }
 0x14f   :  { %433 = shalt.err (!%p430_p1)
}
 0x150   :  { %s442_s29 = smov 128   ;;  %s443_s30 = smov 8  }
 0x151   :  { %330 = dma.vmem_to_hbm [thread:$0]  %s325_s20, 2048, %s539_s1, [#allocation5], %s442_s29, %s442_s29, %s443_s30  }
 0x152   :  { %436 = dma.done.wait [#allocation5], 2048  }
 0x153   :  { %437 = vsyncadd [#allocation5], 4294965248 }
 0x154   :  { %334 = vsyncpa [#allocation4], 1 }
 0x155   :  { %335 = vsyncpa [#allocation5], 1 }

</bundles_post_ra>
